<compile_context>
chip_gen: v6e
topology: v6e:2x2x1
jax: 0.10.0
libtpu: 0.0.40
codegen_flags: <defaults>
</compile_context>

<pallas_src>
import functools

import jax
import jax.numpy as jnp
from jax.experimental import pallas as pl
from jax.experimental.pallas import tpu as pltpu

_NEG_BIG = -1.0e30  # exp(_NEG_BIG - finite) underflows to exactly 0.0 in f32


def _round_up(x, m):
    return (x + m - 1) // m * m


def _auto_batch_tile(o_pad, p_pad, *, max_tile=8, vmem_budget_bytes=8 << 20):
    """Pick Bt so 2 (double-buffer) x Bt*3*Opad*Ppad*2B stays within budget."""
    per_item_bytes = 3 * o_pad * p_pad * 2           # bf16 anchors
    fit = max(1, vmem_budget_bytes // (2 * per_item_bytes))
    return int(min(max_tile, fit))


def _organ_loss_kernel(len_ref, pred_ref, anch_ref, out_ref, *,
                       batch_tile, num_points, inv_voxel_t, inv_organ_t):
    """One grid step == `batch_tile` batch elements.

    len_ref : (Bpad,)                    int32, SMEM (scalar prefetch)
    pred_ref: (Bpad*3,)                  f32,   SMEM (scalar prefetch)
    anch_ref: (Bt, 3, Opad, Ppad)        bf16,  VMEM (coord-major, zero padded)
    out_ref : (1, 1, Bt)                 f32,   VMEM (lane-dense per-item loss)
    """
    blk = pl.program_id(0)
    o_pad = anch_ref.shape[2]
    p_pad = anch_ref.shape[3]

    # Hoisted (shared across the Bt items of this step).
    o_col = jax.lax.broadcasted_iota(jnp.int32, (o_pad, 1), 0)      # (Opad, 1)
    if p_pad != num_points:
        pt_row = jax.lax.broadcasted_iota(jnp.int32, (1, p_pad), 1)  # (1, Ppad)
        pt_valid = pt_row < num_points
    else:
        pt_valid = None                                              # no padded lanes

    base = blk * batch_tile
    for j in range(batch_tile):                      # static unroll, Bt small
        item = base + j
        n_valid = len_ref[item]                      # organs < n_valid are real

        # --- squared distance over the 3 coordinates (VPU, f32) ---
        sq = jnp.zeros((o_pad, p_pad), jnp.float32)
        for c in range(3):                           # K=3: stay off the MXU
            p_c = pred_ref[item * 3 + c]             # scalar read from SMEM
            d = anch_ref[j, c].astype(jnp.float32) - p_c
            sq = sq + d * d
        dist = jnp.sqrt(sq)                          # EUP transcendental

        # --- softmin over sampled points (lane axis) ---
        neg = dist * jnp.float32(-inv_voxel_t)
        if pt_valid is not None:
            neg = jnp.where(pt_valid, neg, jnp.float32(_NEG_BIG))   # padded lanes
        m = jnp.max(neg, axis=1, keepdims=True)      # finite (>=1 valid lane)
        e = jnp.exp(neg - m)                         # padded lanes -> exactly 0
        organ_num = jnp.sum(dist * e, axis=1, keepdims=True)        # (Opad, 1)
        organ_den = jnp.sum(e, axis=1, keepdims=True)               # >= 1
        organ_dm = organ_num * pl.reciprocal(organ_den, approx=True)

        # --- softmin over organs (sublane axis); invalid + padded organs
        #     excluded here (equivalent to the PyTorch 1e15 mask, see header) ---
        neg2 = jnp.where(o_col < n_valid,
                         organ_dm * jnp.float32(-inv_organ_t),
                         jnp.float32(_NEG_BIG))
        m2 = jnp.max(neg2, axis=0, keepdims=True)    # (1, 1)
        e2 = jnp.exp(neg2 - m2)                      # invalid organs -> exactly 0
        num2 = jnp.sum(organ_dm * e2, axis=0, keepdims=True)
        den2 = jnp.sum(e2, axis=0, keepdims=True)
        loss_j = num2 / den2                         # exact divide (scalar loss)

        out_ref[0:1, 0:1, j:j + 1] = loss_j.reshape(1, 1, 1)


def prepare_anchors(anchors, batch_tile=None):
    """Relayout anchors [B, O, P, 3] -> bf16 [Bpad, 3, Opad, Ppad], zero padded.

    Anchors are typically a static atlas: call this ONCE outside the training
    loop and reuse the result (the transpose is a full HBM pass of the largest
    array, so it must not sit on the per-step hot path).
    """
    B, O, P, C = anchors.shape
    assert C == 3
    o_pad = _round_up(O, 16)     # bf16 packs two rows per sublane -> multiple of 16
    p_pad = _round_up(P, 128)    # lane axis (softmin reduction axis), multiple of 128
    bt = int(batch_tile) if batch_tile is not None else min(_auto_batch_tile(o_pad, p_pad), B)
    b_pad = _round_up(B, bt)
    a = jnp.transpose(anchors.astype(jnp.float32), (0, 3, 1, 2))     # (B,3,O,P)
    a = jnp.pad(a, ((0, b_pad - B), (0, 0), (0, o_pad - O), (0, p_pad - P)))
    return a.astype(jnp.bfloat16)


def organ_distance_loss(predictions, anchors_prep, lengths, *,
                        num_organs, num_points,
                        voxel_temperature, organ_temperature,
                        batch_tile=None):
    """Pallas TPU OrganDistanceLoss.forward.

    predictions : f32 [B, 3]
    anchors_prep: bf16 [Bpad, 3, Opad, Ppad] from prepare_anchors()
    lengths     : int  [B]  (assumes max(lengths) == num_organs, as PyTorch requires)
    Returns scalar f32 loss.
    """
    B = predictions.shape[0]
    b_pad, _, o_pad, p_pad = anchors_prep.shape
    assert int(num_organs) <= o_pad and int(num_points) <= p_pad

    bt = int(batch_tile) if batch_tile is not None else min(_auto_batch_tile(o_pad, p_pad), B)
    assert b_pad >= B and b_pad % bt == 0, (b_pad, B, bt)
    num_blocks = b_pad // bt

    # Both scalar-prefetch operands live in SMEM (no per-step VMEM DMA).
    pred_flat = jnp.pad(predictions.astype(jnp.float32),
                        ((0, b_pad - B), (0, 0))).reshape(-1)        # (Bpad*3,)
    lens = jnp.pad(lengths.astype(jnp.int32), (0, b_pad - B),
                   constant_values=1)                                # (Bpad,)

    kernel = functools.partial(
        _organ_loss_kernel,
        batch_tile=bt,
        num_points=int(num_points),
        inv_voxel_t=1.0 / float(voxel_temperature),
        inv_organ_t=1.0 / float(organ_temperature),
    )

    per_batch = pl.pallas_call(
        kernel,
        out_shape=jax.ShapeDtypeStruct((num_blocks, 1, bt), jnp.float32),
        grid_spec=pltpu.PrefetchScalarGridSpec(
            num_scalar_prefetch=2,                   # lengths, predictions -> SMEM
            grid=(num_blocks,),
            in_specs=[
                # Anchors: Bt items per step; only DMA in the pipeline.
                pl.BlockSpec((bt, 3, o_pad, p_pad),
                             lambda blk, lens, preds: (blk, 0, 0, 0)),
            ],
            out_specs=pl.BlockSpec((1, 1, bt),
                                   lambda blk, lens, preds: (blk, 0, 0)),
        ),
        compiler_params=pltpu.CompilerParams(
            # batch blocks are independent -> shard across v7x's 2 TensorCores
            dimension_semantics=("parallel",),
            # 32 MiB: raises v5e's 16 MiB default, matches v6e/v7x scoped
            # defaults, well inside v7x's 64 MiB physical VMEM (anchor tile
            # budget in _auto_batch_tile is 8 MiB double-buffered).
            vmem_limit_bytes=32 * 1024 * 1024,
        ),
    )(lens, pred_flat, anchors_prep)

    return jnp.mean(per_batch.reshape(b_pad)[:B])


def _reference_loss(predictions, anchors, lengths, *,
                    voxel_temperature, organ_temperature):
    """Pure-JAX f32 reference mirroring the PyTorch module."""
    B, O, P, _ = anchors.shape
    mask = jnp.where(
        jnp.arange(O)[None, :] < lengths[:, None], 1.0, 1.0e15
    ).astype(jnp.float32)[:, :, None]                                # (B,O,1)
    preds = predictions[:, None, None, :]                            # (B,1,1,3)
    distances = jnp.linalg.norm(preds - anchors, axis=3)             # (B,O,P)
    dm = distances * mask
    w_vox = jax.nn.softmax(-dm / voxel_temperature, axis=2)
    organ_dm = jnp.sum(dm * w_vox, axis=2)
    w_org = jax.nn.softmax(-organ_dm / organ_temperature, axis=1)
    return jnp.mean(jnp.sum(organ_dm * w_org, axis=1))


if __name__ == "__main__":
    key = jax.random.PRNGKey(0)
    kp, ka = jax.random.split(key)

    B, O, P = 2, 4, 8            # batch, max organs in batch, sampled points
    voxel_T, organ_T = 1.5, 2.0

    predictions = jax.random.normal(kp, (B, 3), dtype=jnp.float32)
    anchors = jax.random.normal(ka, (B, O, P, 3), dtype=jnp.float32)
    lengths = jnp.array([4, 2], dtype=jnp.int32)    # max(lengths) == O

    # One-time relayout (cache this across training steps in real use).
    anchors_prep = prepare_anchors(anchors)

    loss = organ_distance_loss(
        predictions, anchors_prep, lengths,
        num_organs=O, num_points=P,
        voxel_temperature=voxel_T, organ_temperature=organ_T,
    )
    loss = jax.block_until_ready(loss)

    ref = _reference_loss(
        predictions, anchors, lengths,
        voxel_temperature=voxel_T, organ_temperature=organ_T,
    )

    # bf16 anchor loads + approx point-softmin reciprocal -> relaxed tolerance.
    assert bool(jnp.isfinite(loss)), loss
    assert jnp.allclose(loss, ref, rtol=3e-2, atol=3e-3), (loss, ref)

    print("KERNEL_OK")
</pallas_src>

<mosaic_0001>
module attributes {stable_mosaic.version = 11 : i64} {
  func.func @_organ_loss_kernel(%arg0: i32, %arg1: memref<2xi32, #tpu.memory_space<smem>>, %arg2: memref<6xf32, #tpu.memory_space<smem>>, %arg3: memref<2x3x16x128xbf16, #tpu.memory_space<vmem>>, %arg4: memref<1x1x2xf32, #tpu.memory_space<vmem>>) attributes {dimension_semantics = [#tpu.dimension_semantics<parallel>], iteration_bounds = array<i64: 1>, scalar_prefetch = 2 : i64, scratch_operands = 0 : i64, tpu.core_type = #tpu.core_type<tc>, window_params = [{transform_indices = @transform_0, window_bounds = array<i64: 2, 3, 16, 128>}, {transform_indices = @transform_1, window_bounds = array<i64: 1, 1, 2>}]} {
    %0 = tpu.iota {dimensions = array<i32: 0>} : vector<16x1xi32>
    %1 = tpu.iota {dimensions = array<i32: 1>} : vector<1x128xi32>
    %c8_i32 = arith.constant 8 : i32
    %2 = vector.broadcast %c8_i32 : i32 to vector<1x128xi32>
    %3 = arith.cmpi slt, %1, %2 : vector<1x128xi32>
    %c2_i32 = arith.constant 2 : i32
    %4 = arith.muli %arg0, %c2_i32 : i32
    %c0_i32 = arith.constant 0 : i32
    %5 = arith.addi %4, %c0_i32 : i32
    %6 = arith.index_cast %5 : i32 to index
    %7 = memref.load %arg1[%6] : memref<2xi32, #tpu.memory_space<smem>>
    %cst = arith.constant 0.000000e+00 : f32
    %8 = vector.broadcast %cst : f32 to vector<16x128xf32>
    %c3_i32 = arith.constant 3 : i32
    %9 = arith.muli %5, %c3_i32 : i32
    %c0_i32_0 = arith.constant 0 : i32
    %10 = arith.addi %9, %c0_i32_0 : i32
    %11 = arith.index_cast %10 : i32 to index
    %12 = memref.load %arg2[%11] : memref<6xf32, #tpu.memory_space<smem>>
    %c0 = arith.constant 0 : index
    %c0_1 = arith.constant 0 : index
    %c0_2 = arith.constant 0 : index
    %c0_3 = arith.constant 0 : index
    %13 = vector.load %arg3[%c0, %c0_1, %c0_2, %c0_3] : memref<2x3x16x128xbf16, #tpu.memory_space<vmem>>, vector<1x1x16x128xbf16>
    %14 = vector.shape_cast %13 : vector<1x1x16x128xbf16> to vector<16x128xbf16>
    %15 = arith.extf %14 : vector<16x128xbf16> to vector<16x128xf32>
    %16 = vector.broadcast %12 : f32 to vector<16x128xf32>
    %17 = arith.subf %15, %16 : vector<16x128xf32>
    %18 = arith.mulf %17, %17 : vector<16x128xf32>
    %19 = arith.addf %8, %18 : vector<16x128xf32>
    %c3_i32_4 = arith.constant 3 : i32
    %20 = arith.muli %5, %c3_i32_4 : i32
    %c1_i32 = arith.constant 1 : i32
    %21 = arith.addi %20, %c1_i32 : i32
    %22 = arith.index_cast %21 : i32 to index
    %23 = memref.load %arg2[%22] : memref<6xf32, #tpu.memory_space<smem>>
    %c0_5 = arith.constant 0 : index
    %c1 = arith.constant 1 : index
    %c0_6 = arith.constant 0 : index
    %c0_7 = arith.constant 0 : index
    %24 = vector.load %arg3[%c0_5, %c1, %c0_6, %c0_7] : memref<2x3x16x128xbf16, #tpu.memory_space<vmem>>, vector<1x1x16x128xbf16>
    %25 = vector.shape_cast %24 : vector<1x1x16x128xbf16> to vector<16x128xbf16>
    %26 = arith.extf %25 : vector<16x128xbf16> to vector<16x128xf32>
    %27 = vector.broadcast %23 : f32 to vector<16x128xf32>
    %28 = arith.subf %26, %27 : vector<16x128xf32>
    %29 = arith.mulf %28, %28 : vector<16x128xf32>
    %30 = arith.addf %19, %29 : vector<16x128xf32>
    %c3_i32_8 = arith.constant 3 : i32
    %31 = arith.muli %5, %c3_i32_8 : i32
    %c2_i32_9 = arith.constant 2 : i32
    %32 = arith.addi %31, %c2_i32_9 : i32
    %33 = arith.index_cast %32 : i32 to index
    %34 = memref.load %arg2[%33] : memref<6xf32, #tpu.memory_space<smem>>
    %c0_10 = arith.constant 0 : index
    %c2 = arith.constant 2 : index
    %c0_11 = arith.constant 0 : index
    %c0_12 = arith.constant 0 : index
    %35 = vector.load %arg3[%c0_10, %c2, %c0_11, %c0_12] : memref<2x3x16x128xbf16, #tpu.memory_space<vmem>>, vector<1x1x16x128xbf16>
    %36 = vector.shape_cast %35 : vector<1x1x16x128xbf16> to vector<16x128xbf16>
    %37 = arith.extf %36 : vector<16x128xbf16> to vector<16x128xf32>
    %38 = vector.broadcast %34 : f32 to vector<16x128xf32>
    %39 = arith.subf %37, %38 : vector<16x128xf32>
    %40 = arith.mulf %39, %39 : vector<16x128xf32>
    %41 = arith.addf %30, %40 : vector<16x128xf32>
    %42 = math.sqrt %41 : vector<16x128xf32>
    %cst_13 = arith.constant -0.666666686 : f32
    %43 = vector.broadcast %cst_13 : f32 to vector<16x128xf32>
    %44 = arith.mulf %42, %43 : vector<16x128xf32>
    %cst_14 = arith.constant -1.000000e+30 : f32
    %45 = vector.shape_cast %3 : vector<1x128xi1> to vector<1x128xi1>
    %46 = vector.broadcast %45 : vector<1x128xi1> to vector<16x128xi1>
    %47 = vector.broadcast %cst_14 : f32 to vector<16x128xf32>
    %48 = arith.select %46, %44, %47 : vector<16x128xi1>, vector<16x128xf32>
    %cst_15 = arith.constant dense<0xFF800000> : vector<16xf32>
    %49 = vector.multi_reduction <maximumf>, %48, %cst_15 [1] : vector<16x128xf32> to vector<16xf32>
    %50 = vector.shape_cast %49 : vector<16xf32> to vector<16x1xf32>
    %51 = vector.broadcast %50 : vector<16x1xf32> to vector<16x128xf32>
    %52 = arith.subf %48, %51 : vector<16x128xf32>
    %53 = math.exp %52 : vector<16x128xf32>
    %54 = arith.mulf %42, %53 : vector<16x128xf32>
    %cst_16 = arith.constant dense<0.000000e+00> : vector<16xf32>
    %55 = vector.multi_reduction <add>, %54, %cst_16 [1] : vector<16x128xf32> to vector<16xf32>
    %56 = vector.shape_cast %55 : vector<16xf32> to vector<16x1xf32>
    %cst_17 = arith.constant dense<0.000000e+00> : vector<16xf32>
    %57 = vector.multi_reduction <add>, %53, %cst_17 [1] : vector<16x128xf32> to vector<16xf32>
    %58 = vector.shape_cast %57 : vector<16xf32> to vector<16x1xf32>
    %59 = tpu.reciprocal %58 {approx = true} : vector<16x1xf32> -> vector<16x1xf32>
    %60 = arith.mulf %56, %59 : vector<16x1xf32>
    %61 = vector.broadcast %7 : i32 to vector<16x1xi32>
    %62 = arith.cmpi slt, %0, %61 : vector<16x1xi32>
    %cst_18 = arith.constant -5.000000e-01 : f32
    %63 = vector.broadcast %cst_18 : f32 to vector<16x1xf32>
    %64 = arith.mulf %60, %63 : vector<16x1xf32>
    %cst_19 = arith.constant -1.000000e+30 : f32
    %65 = vector.broadcast %cst_19 : f32 to vector<16x1xf32>
    %66 = arith.select %62, %64, %65 : vector<16x1xi1>, vector<16x1xf32>
    %cst_20 = arith.constant dense<0xFF800000> : vector<1xf32>
    %67 = vector.multi_reduction <maximumf>, %66, %cst_20 [0] : vector<16x1xf32> to vector<1xf32>
    %68 = vector.shape_cast %67 : vector<1xf32> to vector<1x1xf32>
    %69 = vector.broadcast %68 : vector<1x1xf32> to vector<16x1xf32>
    %70 = arith.subf %66, %69 : vector<16x1xf32>
    %71 = math.exp %70 : vector<16x1xf32>
    %72 = arith.mulf %60, %71 : vector<16x1xf32>
    %cst_21 = arith.constant dense<0.000000e+00> : vector<1xf32>
    %73 = vector.multi_reduction <add>, %72, %cst_21 [0] : vector<16x1xf32> to vector<1xf32>
    %74 = vector.shape_cast %73 : vector<1xf32> to vector<1x1xf32>
    %cst_22 = arith.constant dense<0.000000e+00> : vector<1xf32>
    %75 = vector.multi_reduction <add>, %71, %cst_22 [0] : vector<16x1xf32> to vector<1xf32>
    %76 = vector.shape_cast %75 : vector<1xf32> to vector<1x1xf32>
    %77 = arith.divf %74, %76 : vector<1x1xf32>
    %78 = vector.shape_cast %77 : vector<1x1xf32> to vector<1x1x1xf32>
    %c0_23 = arith.constant 0 : index
    %c0_24 = arith.constant 0 : index
    %c0_25 = arith.constant 0 : index
    %79 = vector.load %arg4[%c0_23, %c0_24, %c0_25] : memref<1x1x2xf32, #tpu.memory_space<vmem>>, vector<1x1x1xf32>
    tpu.vector_store %arg4[%c0_23, %c0_24, %c0_25], %78 {strides = array<i32>} : memref<1x1x2xf32, #tpu.memory_space<vmem>>, vector<1x1x1xf32>,
    %c1_i32_26 = arith.constant 1 : i32
    %80 = arith.addi %4, %c1_i32_26 : i32
    %81 = arith.index_cast %80 : i32 to index
    %82 = memref.load %arg1[%81] : memref<2xi32, #tpu.memory_space<smem>>
    %cst_27 = arith.constant 0.000000e+00 : f32
    %83 = vector.broadcast %cst_27 : f32 to vector<16x128xf32>
    %c3_i32_28 = arith.constant 3 : i32
    %84 = arith.muli %80, %c3_i32_28 : i32
    %c0_i32_29 = arith.constant 0 : i32
    %85 = arith.addi %84, %c0_i32_29 : i32
    %86 = arith.index_cast %85 : i32 to index
    %87 = memref.load %arg2[%86] : memref<6xf32, #tpu.memory_space<smem>>
    %c1_30 = arith.constant 1 : index
    %c0_31 = arith.constant 0 : index
    %c0_32 = arith.constant 0 : index
    %c0_33 = arith.constant 0 : index
    %88 = vector.load %arg3[%c1_30, %c0_31, %c0_32, %c0_33] : memref<2x3x16x128xbf16, #tpu.memory_space<vmem>>, vector<1x1x16x128xbf16>
    %89 = vector.shape_cast %88 : vector<1x1x16x128xbf16> to vector<16x128xbf16>
    %90 = arith.extf %89 : vector<16x128xbf16> to vector<16x128xf32>
    %91 = vector.broadcast %87 : f32 to vector<16x128xf32>
    %92 = arith.subf %90, %91 : vector<16x128xf32>
    %93 = arith.mulf %92, %92 : vector<16x128xf32>
    %94 = arith.addf %83, %93 : vector<16x128xf32>
    %c3_i32_34 = arith.constant 3 : i32
    %95 = arith.muli %80, %c3_i32_34 : i32
    %c1_i32_35 = arith.constant 1 : i32
    %96 = arith.addi %95, %c1_i32_35 : i32
    %97 = arith.index_cast %96 : i32 to index
    %98 = memref.load %arg2[%97] : memref<6xf32, #tpu.memory_space<smem>>
    %c1_36 = arith.constant 1 : index
    %c1_37 = arith.constant 1 : index
    %c0_38 = arith.constant 0 : index
    %c0_39 = arith.constant 0 : index
    %99 = vector.load %arg3[%c1_36, %c1_37, %c0_38, %c0_39] : memref<2x3x16x128xbf16, #tpu.memory_space<vmem>>, vector<1x1x16x128xbf16>
    %100 = vector.shape_cast %99 : vector<1x1x16x128xbf16> to vector<16x128xbf16>
    %101 = arith.extf %100 : vector<16x128xbf16> to vector<16x128xf32>
    %102 = vector.broadcast %98 : f32 to vector<16x128xf32>
    %103 = arith.subf %101, %102 : vector<16x128xf32>
    %104 = arith.mulf %103, %103 : vector<16x128xf32>
    %105 = arith.addf %94, %104 : vector<16x128xf32>
    %c3_i32_40 = arith.constant 3 : i32
    %106 = arith.muli %80, %c3_i32_40 : i32
    %c2_i32_41 = arith.constant 2 : i32
    %107 = arith.addi %106, %c2_i32_41 : i32
    %108 = arith.index_cast %107 : i32 to index
    %109 = memref.load %arg2[%108] : memref<6xf32, #tpu.memory_space<smem>>
    %c1_42 = arith.constant 1 : index
    %c2_43 = arith.constant 2 : index
    %c0_44 = arith.constant 0 : index
    %c0_45 = arith.constant 0 : index
    %110 = vector.load %arg3[%c1_42, %c2_43, %c0_44, %c0_45] : memref<2x3x16x128xbf16, #tpu.memory_space<vmem>>, vector<1x1x16x128xbf16>
    %111 = vector.shape_cast %110 : vector<1x1x16x128xbf16> to vector<16x128xbf16>
    %112 = arith.extf %111 : vector<16x128xbf16> to vector<16x128xf32>
    %113 = vector.broadcast %109 : f32 to vector<16x128xf32>
    %114 = arith.subf %112, %113 : vector<16x128xf32>
    %115 = arith.mulf %114, %114 : vector<16x128xf32>
    %116 = arith.addf %105, %115 : vector<16x128xf32>
    %117 = math.sqrt %116 : vector<16x128xf32>
    %cst_46 = arith.constant -0.666666686 : f32
    %118 = vector.broadcast %cst_46 : f32 to vector<16x128xf32>
    %119 = arith.mulf %117, %118 : vector<16x128xf32>
    %cst_47 = arith.constant -1.000000e+30 : f32
    %120 = vector.shape_cast %3 : vector<1x128xi1> to vector<1x128xi1>
    %121 = vector.broadcast %120 : vector<1x128xi1> to vector<16x128xi1>
    %122 = vector.broadcast %cst_47 : f32 to vector<16x128xf32>
    %123 = arith.select %121, %119, %122 : vector<16x128xi1>, vector<16x128xf32>
    %cst_48 = arith.constant dense<0xFF800000> : vector<16xf32>
    %124 = vector.multi_reduction <maximumf>, %123, %cst_48 [1] : vector<16x128xf32> to vector<16xf32>
    %125 = vector.shape_cast %124 : vector<16xf32> to vector<16x1xf32>
    %126 = vector.broadcast %125 : vector<16x1xf32> to vector<16x128xf32>
    %127 = arith.subf %123, %126 : vector<16x128xf32>
    %128 = math.exp %127 : vector<16x128xf32>
    %129 = arith.mulf %117, %128 : vector<16x128xf32>
    %cst_49 = arith.constant dense<0.000000e+00> : vector<16xf32>
    %130 = vector.multi_reduction <add>, %129, %cst_49 [1] : vector<16x128xf32> to vector<16xf32>
    %131 = vector.shape_cast %130 : vector<16xf32> to vector<16x1xf32>
    %cst_50 = arith.constant dense<0.000000e+00> : vector<16xf32>
    %132 = vector.multi_reduction <add>, %128, %cst_50 [1] : vector<16x128xf32> to vector<16xf32>
    %133 = vector.shape_cast %132 : vector<16xf32> to vector<16x1xf32>
    %134 = tpu.reciprocal %133 {approx = true} : vector<16x1xf32> -> vector<16x1xf32>
    %135 = arith.mulf %131, %134 : vector<16x1xf32>
    %136 = vector.broadcast %82 : i32 to vector<16x1xi32>
    %137 = arith.cmpi slt, %0, %136 : vector<16x1xi32>
    %cst_51 = arith.constant -5.000000e-01 : f32
    %138 = vector.broadcast %cst_51 : f32 to vector<16x1xf32>
    %139 = arith.mulf %135, %138 : vector<16x1xf32>
    %cst_52 = arith.constant -1.000000e+30 : f32
    %140 = vector.broadcast %cst_52 : f32 to vector<16x1xf32>
    %141 = arith.select %137, %139, %140 : vector<16x1xi1>, vector<16x1xf32>
    %cst_53 = arith.constant dense<0xFF800000> : vector<1xf32>
    %142 = vector.multi_reduction <maximumf>, %141, %cst_53 [0] : vector<16x1xf32> to vector<1xf32>
    %143 = vector.shape_cast %142 : vector<1xf32> to vector<1x1xf32>
    %144 = vector.broadcast %143 : vector<1x1xf32> to vector<16x1xf32>
    %145 = arith.subf %141, %144 : vector<16x1xf32>
    %146 = math.exp %145 : vector<16x1xf32>
    %147 = arith.mulf %135, %146 : vector<16x1xf32>
    %cst_54 = arith.constant dense<0.000000e+00> : vector<1xf32>
    %148 = vector.multi_reduction <add>, %147, %cst_54 [0] : vector<16x1xf32> to vector<1xf32>
    %149 = vector.shape_cast %148 : vector<1xf32> to vector<1x1xf32>
    %cst_55 = arith.constant dense<0.000000e+00> : vector<1xf32>
    %150 = vector.multi_reduction <add>, %146, %cst_55 [0] : vector<16x1xf32> to vector<1xf32>
    %151 = vector.shape_cast %150 : vector<1xf32> to vector<1x1xf32>
    %152 = arith.divf %149, %151 : vector<1x1xf32>
    %153 = vector.shape_cast %152 : vector<1x1xf32> to vector<1x1x1xf32>
    %c0_56 = arith.constant 0 : index
    %c0_57 = arith.constant 0 : index
    %c1_58 = arith.constant 1 : index
    %154 = vector.load %arg4[%c0_56, %c0_57, %c1_58] : memref<1x1x2xf32, #tpu.memory_space<vmem>>, vector<1x1x1xf32>
    tpu.vector_store %arg4[%c0_56, %c0_57, %c1_58], %153 {strides = array<i32>} : memref<1x1x2xf32, #tpu.memory_space<vmem>>, vector<1x1x1xf32>,
    return
  }
  func.func @transform_0(%arg0: i32, %arg1: memref<2xi32, #tpu.memory_space<smem>>, %arg2: memref<6xf32, #tpu.memory_space<smem>>) -> (i32, i32, i32, i32) {
    %c0_i32 = arith.constant 0 : i32
    %c0_i32_0 = arith.constant 0 : i32
    %c0_i32_1 = arith.constant 0 : i32
    %c0_i32_2 = arith.constant 0 : i32
    return %arg0, %c0_i32, %c0_i32_0, %c0_i32_1 : i32, i32, i32, i32
  }
  func.func @transform_1(%arg0: i32, %arg1: memref<2xi32, #tpu.memory_space<smem>>, %arg2: memref<6xf32, #tpu.memory_space<smem>>) -> (i32, i32, i32) {
    %c0_i32 = arith.constant 0 : i32
    %c0_i32_0 = arith.constant 0 : i32
    %c0_i32_1 = arith.constant 0 : i32
    return %arg0, %c0_i32, %c0_i32_0 : i32, i32, i32
  }
}

</mosaic_0001>

<bundles_post_ra>
// kernel: tpu_custom_call.1
= control target key start
LH: loop header
LB: loop body
LE: loop exit
PB: predicated region body
PF: predicated region fallthrough
CT: control target
= control target key end

     0   :  { %s445_s12 = smov [#allocation3]   ;;  %s507_s0 = inlined_call_operand.hbm [shape: s32[2], index: 0, kind: input, shape index: {}]   ;;  %s508_s2 = inlined_call_operand.hbm [shape: bf16[2,3,16,128], index: 2, kind: input, shape index: {}]   ;;  %s509_s3 = inlined_call_operand.hbm [shape: f32[1,1,2], index: 3, kind: output, shape index: {}]   ;;  %s510_s1 = inlined_call_operand.vmem [shape: f32[6], index: 1, kind: input, shape index: {}]  }
   0x1   :  { %9 = dma.hbm_to_smem %s507_s0, 16, %s445_s12, [#allocation2] }
   0x2   :  { %s10_s17 = sshll.u32 %s510_s1, 4  ;;  %s11_s17 = int_to_ptr.vmem [resolvable:$true] %s10_s17 }
   0x3   :  { %s387_s18 = scalar_lea.vmem %s11_s17, 16  ;;  %p392_p1 = scmp.lt.s32.totalorder %s11_s17, %s11_s17 }
   0x4   :  { %p388_p0 = scmp.ne.s32.totalorder %s11_s17, %s387_s18  ;;  %p393_p2 = scmp.lt.s32.totalorder %s387_s18, %s387_s18 }
   0x6   :  { %p394_p3 = por %p393_p2, %p392_p1 }
   0x8   :  { %p395_p4 = pnand %p394_p3, %p388_p0 }
   0xa   :  { %398 = shalt.err (!%p395_p4)  }
   0xb   :  { %s446_s19 = smov [#allocation4]  }
   0xc   :  { %13 = dma.vmem_to_smem %s11_s17, 16, %s446_s19, [#allocation2] }
   0xd   :  { %439 = dma.done.wait [#allocation2], 32 }
   0xe   :  { %440 = vsyncadd [#allocation2], 4294967264 }
   0xf   :  { %15 = sfence }
  0x10   :  { %16 = vsyncpa [#allocation6], 0 }
  0x11   :  { %17 = vsyncpa [#allocation7], 0  ;;  %s447_s0 = smov [#allocation5]  }
  0x12   :  { %s23_s20 = sshll.u32 %s447_s0, 4  ;;  %s24_s20 = int_to_ptr.vmem [resolvable:$true] %s23_s20 }
  0x13   :  { %s407_s21 = scalar_lea.vmem %s24_s20, 768  ;;  %p412_p6 = scmp.lt.s32.totalorder %s24_s20, %s24_s20 }
  0x14   :  { %p408_p5 = scmp.ne.s32.totalorder %s24_s20, %s407_s21  ;;  %p413_p7 = scmp.lt.s32.totalorder %s407_s21, %s407_s21 }
  0x16   :  { %p414_p8 = por %p413_p7, %p412_p6 }
  0x18   :  { %p415_p9 = pnand %p414_p8, %p408_p5 }
  0x1a   :  { %418 = shalt.err (!%p415_p9)
}
  0x1b   :  { %s448_s1 = smov 64   ;;  %s449_s22 = smov 4  }
  0x1c   :  { %29 = dma.hbm_to_vmem [thread:$0]  %s508_s2, 768, %s24_s20, [#allocation6], %s448_s1, %s448_s1, %s449_s22  }
  0x1d   :  { %441 = dma.done.wait [#allocation6], 768  }
  0x1e   :  { %442 = vsyncadd [#allocation6], 4294966528  ;;  %s480_s25 = sld [smem:[#allocation4]]  ;;  %v314_v0 = vld [vmem:[#allocation5] sm:$0xff]   ;;  %v318_v2 = vld [vmem:[#allocation5 + $0x8] sm:$0xff]   ;;  %v33_v56 = vlaneseq  ;;  %vm164_vm13 = vcmask 0  }
  0x1f   :  { %s482_s26 = sld [smem:[#allocation4 + $0x1]]  ;;  %v322_v3 = vld [vmem:[#allocation5 + $0x10] sm:$0xff]   ;;  %v315_v4 = vunpack.c.l.bf16 %v314_v0  ;;  %v319_v5 = vunpack.c.l.bf16 %v318_v2  ;;  %v326_v8 = vld [vmem:[#allocation5 + $0x18] sm:$0xff]   ;;  %v330_v9 = vld [vmem:[#allocation5 + $0x20] sm:$0xff]   ;;  %v316_v21 = vunpack.c.h.bf16 %v314_v0  ;;  %v320_v22 = vunpack.c.h.bf16 %v318_v2  ;;  %s450_s5 = smov [#allocation8]  }
  0x20   :  { %s484_s27 = sld [smem:[#allocation4 + $0x2]]  ;;  %v323_v7 = vunpack.c.l.bf16 %v322_v3  ;;  %v334_v10 = vld [vmem:[#allocation5 + $0x28] sm:$0xff]   ;;  %v327_v12 = vunpack.c.l.bf16 %v326_v8  ;;  %v331_v13 = vunpack.c.l.bf16 %v330_v9  ;;  %v324_v34 = vunpack.c.h.bf16 %v322_v3  ;;  %s298_s6 = sshll.u32 %s450_s5, 4  ;;  %s299_s6 = int_to_ptr.vmem [resolvable:$true] %s298_s6 }
  0x21   :  { %s486_s28 = sld [smem:[#allocation4 + $0x3]]  ;;  %v335_v14 = vunpack.c.l.bf16 %v334_v10  ;;  %v328_v37 = vunpack.c.h.bf16 %v326_v8  ;;  %v332_v38 = vunpack.c.h.bf16 %v330_v9  ;;  %v336_v45 = vunpack.c.h.bf16 %v334_v10  ;;  %s419_s7 = scalar_lea.vmem %s299_s6, 16 }
  0x22   :  { %s488_s29 = sld [smem:[#allocation4 + $0x4]]  ;;  %v37_v58 = vand.u32 127, %v33_v56  ;;  %vm290_vm14 = vcmask 8200   ;;  %p420_p10 = scmp.ne.s32.totalorder %s299_s6, %s419_s7 }
  0x23   :  { %s490_s30 = sld [smem:[#allocation4 + $0x5]]  ;;  %s423_s8 = scalar_lea.vmem %s299_s6, 32 }
  0x24   :  { %v47_v1 = vstv %s480_s25  ;;  %vm38_vm3 = vcmp.lt.s32.totalorder %v37_v58, 8  ;;  %s40_s2 = sld [smem:[#allocation3]]  ;;  %p424_p11 = scmp.lt.s32.totalorder %s299_s6, %s299_s6 }
  0x25   :  { %v61_v6 = vstv %s482_s26  ;;  %v48_v15 = vsub.f32 %v315_v4, %v47_v1  ;;  %v49_v29 = vsub.f32 %v316_v21, %v47_v1  ;;  %s309_s4 = sld [smem:[#allocation3 + $0x1]]  ;;  %p425_p12 = scmp.lt.s32.totalorder %s423_s8, %s419_s7 }
  0x26   :  { %v75_v11 = vstv %s484_s27  ;;  %v62_v16 = vsub.f32 %v319_v5, %v61_v6  ;;  %v63_v30 = vsub.f32 %v320_v22, %v61_v6 }
  0x27   :  { %v76_v17 = vsub.f32 %v323_v7, %v75_v11  ;;  %v175_v18 = vstv %s486_s28  ;;  %v50_v23 = vmul.f32 %v48_v15, %v48_v15  ;;  %v51_v35 = vmul.f32 %v49_v29, %v49_v29  ;;  %p426_p13 = por %p425_p12, %p424_p11 }
  0x28   :  { %v176_v19 = vsub.f32 %v327_v12, %v175_v18  ;;  %v189_v20 = vstv %s488_s29  ;;  %v64_v24 = vmul.f32 %v62_v16, %v62_v16  ;;  %v65_v36 = vmul.f32 %v63_v30, %v63_v30 }
  0x29   :  { %v78_v25 = vmul.f32 %v76_v17, %v76_v17  ;;  %v190_v26 = vsub.f32 %v331_v13, %v189_v20  ;;  %v203_v28 = vstv %s490_s30  ;;  %v77_v42 = vsub.f32 %v324_v34, %v75_v11  ;;  %p427_p0 = pnand %p426_p13, %p420_p10 }
  0x2a   :  { %v178_v27 = vmul.f32 %v176_v19, %v176_v19  ;;  %v66_v31 = vadd.f32 %v64_v24, %v50_v23  ;;  %v204_v33 = vsub.f32 %v335_v14, %v203_v28  ;;  %v177_v43 = vsub.f32 %v328_v37, %v175_v18 }
  0x2b   :  { %v192_v32 = vmul.f32 %v190_v26, %v190_v26  ;;  %v191_v44 = vsub.f32 %v332_v38, %v189_v20  ;;  %v67_v46 = vadd.f32 %v65_v36, %v51_v35  ;;  %v79_v48 = vmul.f32 %v77_v42, %v77_v42 }
  0x2c   :  { %v80_v39 = vadd.f32 %v78_v25, %v66_v31  ;;  %v206_v41 = vmul.f32 %v204_v33, %v204_v33  ;;  %v179_v49 = vmul.f32 %v177_v43, %v177_v43  ;;  %v205_v51 = vsub.f32 %v336_v45, %v203_v28 }
  0x2d   :  { %v194_v40 = vadd.f32 %v192_v32, %v178_v27  ;;  %v193_v50 = vmul.f32 %v191_v44, %v191_v44  ;;  %v81_v52 = vadd.f32 %v79_v48, %v67_v46  ;;  %v34_v48 = vshrl.u32 %v33_v56, 7 }
  0x2e   :  { %343 = vrsqrt.f32 %v80_v39  ;;  %v207_v54 = vmul.f32 %v205_v51, %v205_v51  ;;  %vm84_vm0 = vcmp.eq.f32.partialorder %v80_v39, inf  ;;  %v87_v59 = vand.u32 2147483648, %v80_v39 }
  0x2f   :  { %v208_v47 = vadd.f32 %v206_v41, %v194_v40  ;;  %v195_v53 = vadd.f32 %v193_v50, %v179_v49  ;;  %vm86_vm1 = vcmp.eq.f32.partialorder %v80_v39, 0.0  ;;  %vm91_vm5 = vcmp.eq.f32.partialorder %v81_v52, inf }
  0x30   :  { %v94_v5 = vand.u32 2147483648, %v81_v52  ;;  %vm93_vm6 = vcmp.eq.f32.partialorder %v81_v52, 0.0  ;;  %v35_v51 = vadd.s32 8, %v34_v48 }
  0x31   :  { %345 = vrsqrt.f32 %v208_v47  ;;  %v209_v55 = vadd.f32 %v207_v54, %v195_v53  ;;  %vm212_vm2 = vcmp.eq.f32.partialorder %v208_v47, inf  ;;  %v215_v63 = vand.u32 2147483648, %v208_v47 }
  0x32   :  { %347 = vrsqrt.f32 %v81_v52  ;;  %vm214_vm4 = vcmp.eq.f32.partialorder %v208_v47, 0.0  ;;  %v126_v53 = vstv %s40_s2 }
  0x33   :  { %349 = vrsqrt.f32 %v209_v55  ;;  %vm219_vm7 = vcmp.eq.f32.partialorder %v209_v55, inf  ;;  %v222_v12 = vand.u32 2147483648, %v209_v55  ;;  %vm221_vm8 = vcmp.eq.f32.partialorder %v209_v55, 0.0 }
  0x34   :  { %vm127_vm9 = vcmp.lt.s32.totalorder %v34_v48, %v126_v53  ;;  %vm128_vm10 = vcmp.lt.s32.totalorder %v35_v51, %v126_v53 }
  0x3b   :  { %v344_v57 = vpop.eup %343 }
  0x3c   :  { %v83_v60 = vmul.f32 %v344_v57, %v80_v39 }
  0x3e   :  { %v346_v61 = vpop.eup %345  ;;  %v85_v62 = vsel %vm84_vm0, %v80_v39, %v83_v60 }
  0x3f   :  { %v88_v0 = vsel %vm86_vm1, %v87_v59, %v85_v62  ;;  %v211_v1 = vmul.f32 %v346_v61, %v208_v47  ;;  %v348_v3 = vpop.eup %347  ;;  %v252_v61 = vstv %s309_s4 }
  0x40   :  { %v96_v2 = vmul.f32 -0.6666667, %v88_v0  ;;  %v90_v8 = vmul.f32 %v348_v3, %v81_v52  ;;  %v350_v10 = vpop.eup %349  ;;  %vm253_vm11 = vcmp.lt.s32.totalorder %v34_v48, %v252_v61  ;;  %vm254_vm12 = vcmp.lt.s32.totalorder %v35_v51, %v252_v61 }
  0x41   :  { %v213_v4 = vsel %vm212_vm2, %v208_v47, %v211_v1  ;;  %v218_v15 = vmul.f32 %v350_v10, %v209_v55 }
  0x42   :  { %v100_v6 = vsel %vm38_vm3, %v96_v2, -1e+30  ;;  %v216_v7 = vsel %vm214_vm4, %v215_v63, %v213_v4  ;;  %v92_v11 = vsel %vm91_vm5, %v81_v52, %v90_v8 }
  0x43   :  { %102 = vmax.xlane.f32.xlu0 %v100_v6  ;;  %v224_v9 = vmul.f32 -0.6666667, %v216_v7  ;;  %v95_v14 = vsel %vm93_vm6, %v94_v5, %v92_v11  ;;  %v220_v17 = vsel %vm219_vm7, %v209_v55, %v218_v15 }
  0x44   :  { %v97_v16 = vmul.f32 -0.6666667, %v95_v14  ;;  %v223_v19 = vsel %vm221_vm8, %v222_v12, %v220_v17 }
  0x45   :  { %v226_v13 = vsel %vm38_vm3, %v224_v9, -1e+30  ;;  %v225_v20 = vmul.f32 -0.6666667, %v223_v19 }
  0x46   :  { %228 = vmax.xlane.f32.xlu1 %v226_v13  ;;  %v101_v18 = vsel %vm38_vm3, %v97_v16, -1e+30 }
  0x47   :  { %104 = vmax.xlane.f32.xlu0 %v101_v18  ;;  %v227_v21 = vsel %vm38_vm3, %v225_v20, -1e+30 }
  0x4a   :  { %230 = vmax.xlane.f32.xlu1 %v227_v21 }
  0xcc   :  { %v103_v22 = vpop.xlane.xlu0 %102 }
  0xcd   :  { %v106_v23 = vsub.f32 %v100_v6, %v103_v22 }
  0xcf   :  { %v108_v24 = vmul.f32 1.442695, %v106_v23  ;;  %v229_v25 = vpop.xlane.xlu1 %228 }
  0xd0   :  { %v232_v26 = vsub.f32 %v226_v13, %v229_v25  ;;  %v105_v28 = vpop.xlane.xlu0 %104 }
  0xd1   :  { %351 = vpow2.f32 %v108_v24  ;;  %v107_v29 = vsub.f32 %v101_v18, %v105_v28 }
  0xd2   :  { %v234_v27 = vmul.f32 1.442695, %v232_v26 }
  0xd3   :  { %v110_v30 = vmul.f32 1.442695, %v107_v29  ;;  %v231_v31 = vpop.xlane.xlu1 %230 }
  0xd4   :  { %353 = vpow2.f32 %v234_v27  ;;  %v233_v32 = vsub.f32 %v227_v21, %v231_v31 }
  0xd5   :  { %355 = vpow2.f32 %v110_v30 }
  0xd6   :  { %v236_v33 = vmul.f32 1.442695, %v233_v32 }
  0xd8   :  { %357 = vpow2.f32 %v236_v33 }
  0xde   :  { %v352_v34 = vpop.eup %351 }
  0xdf   :  { %118 = vadd.xlane.f32.xlu0 %v352_v34  ;;  %v112_v37 = vmul.f32 %v352_v34, %v88_v0 }
  0xe1   :  { %v354_v35 = vpop.eup %353 }
  0xe2   :  { %v356_v36 = vpop.eup %355  ;;  %v238_v39 = vmul.f32 %v354_v35, %v216_v7 }
  0xe3   :  { %244 = vadd.xlane.f32.xlu0 %v354_v35  ;;  %120 = vadd.xlane.f32.xlu1 %v356_v36  ;;  %v113_v40 = vmul.f32 %v356_v36, %v95_v14 }
  0xe5   :  { %v358_v38 = vpop.eup %357 }
  0xe6   :  { %v239_v41 = vmul.f32 %v358_v38, %v223_v19 }
  0xe7   :  { %114 = vadd.xlane.f32.xlu0 %v112_v37  ;;  %246 = vadd.xlane.f32.xlu1 %v358_v38 }
  0xeb   :  { %240 = vadd.xlane.f32.xlu0 %v238_v39  ;;  %116 = vadd.xlane.f32.xlu1 %v113_v40 }
  0xef   :  { %242 = vadd.xlane.f32.xlu1 %v239_v41 }
 0x168   :  { %v119_v42 = vpop.xlane.xlu0 %118 }
 0x169   :  { %359 = vrcp.f32 %v119_v42 }
 0x16c   :  { %v245_v43 = vpop.xlane.xlu0 %244  ;;  %v121_v44 = vpop.xlane.xlu1 %120 }
 0x16d   :  { %361 = vrcp.f32 %v245_v43 }
 0x16e   :  { %363 = vrcp.f32 %v121_v44 }
 0x170   :  { %v247_v45 = vpop.xlane.xlu1 %246  ;;  %v115_v47 = vpop.xlane.xlu0 %114 }
 0x171   :  { %365 = vrcp.f32 %v247_v45 }
 0x174   :  { %v117_v52 = vpop.xlane.xlu1 %116  ;;  %v241_v55 = vpop.xlane.xlu0 %240 }
 0x176   :  { %v360_v46 = vpop.eup %359 }
 0x177   :  { %v124_v49 = vmul.f32 %v360_v46, %v115_v47 }
 0x178   :  { %v243_v63 = vpop.xlane.xlu1 %242 }
 0x179   :  { %v129_v57 = vmul.f32 -0.5, %v124_v49 }
 0x17a   :  { %v362_v50 = vpop.eup %361 }
 0x17b   :  { %v364_v54 = vpop.eup %363  ;;  %v250_v59 = vmul.f32 %v362_v50, %v241_v55  ;;  %v131_v0 = vsel %vm127_vm9, %v129_v57, -1e+30 }
 0x17c   :  { %v125_v58 = vmul.f32 %v364_v54, %v117_v52 }
 0x17d   :  { %v255_v2 = vmul.f32 -0.5, %v250_v59 }
 0x17e   :  { %v130_v60 = vmul.f32 -0.5, %v125_v58  ;;  %v366_v62 = vpop.eup %365 }
 0x17f   :  { %v251_v56 = vmul.f32 %v366_v62, %v243_v63  ;;  %v257_v6 = vsel %vm253_vm11, %v255_v2, -1e+30 }
 0x180   :  { %v132_v1 = vsel %vm128_vm10, %v130_v60, -1e+30 }
 0x181   :  { %v133_v3 = vmax.f32 %v131_v0, %v132_v1  ;;  %v256_v4 = vmul.f32 -0.5, %v251_v56 }
 0x183   :  { %v134_v5 = vrot.slane %v133_v3, 4  ;;  %v258_v7 = vsel %vm254_vm12, %v256_v4, -1e+30 }
 0x184   :  { %v259_v9 = vmax.f32 %v257_v6, %v258_v7 }
 0x185   :  { %v135_v8 = vmax.f32 %v133_v3, %v134_v5 }
 0x186   :  { %v260_v11 = vrot.slane %v259_v9, 4 }
 0x187   :  { %v136_v10 = vrot.slane %v135_v8, 2 }
 0x188   :  { %v261_v13 = vmax.f32 %v259_v9, %v260_v11 }
 0x189   :  { %v137_v12 = vmax.f32 %v135_v8, %v136_v10 }
 0x18a   :  { %v262_v15 = vrot.slane %v261_v13, 2 }
 0x18b   :  { %v138_v14 = vrot.slane %v137_v12, 1 }
 0x18c   :  { %v263_v17 = vmax.f32 %v261_v13, %v262_v15 }
 0x18d   :  { %v139_v16 = vmax.f32 %v137_v12, %v138_v14 }
 0x18e   :  { %v264_v20 = vrot.slane %v263_v17, 1 }
 0x18f   :  { %v140_v18 = vsub.f32 %v131_v0, %v139_v16  ;;  %v141_v19 = vsub.f32 %v132_v1, %v139_v16 }
 0x190   :  { %v265_v23 = vmax.f32 %v263_v17, %v264_v20 }
 0x191   :  { %v142_v21 = vmul.f32 1.442695, %v140_v18  ;;  %v144_v22 = vmul.f32 1.442695, %v141_v19 }
 0x192   :  { %v266_v24 = vsub.f32 %v257_v6, %v265_v23  ;;  %v267_v25 = vsub.f32 %v258_v7, %v265_v23 }
 0x193   :  { %367 = vpow2.f32 %v142_v21 }
 0x194   :  { %369 = vpow2.f32 %v144_v22  ;;  %v268_v26 = vmul.f32 1.442695, %v266_v24  ;;  %v270_v27 = vmul.f32 1.442695, %v267_v25 }
 0x196   :  { %371 = vpow2.f32 %v268_v26 }
 0x197   :  { %373 = vpow2.f32 %v270_v27 }
 0x1a0   :  { %v368_v28 = vpop.eup %367 }
 0x1a1   :  { %v370_v29 = vpop.eup %369  ;;  %v146_v30 = vmul.f32 %v368_v28, %v124_v49 }
 0x1a2   :  { %v147_v31 = vmul.f32 %v370_v29, %v125_v58  ;;  %v155_v32 = vadd.f32 %v370_v29, %v368_v28 }
 0x1a3   :  { %v372_v33 = vpop.eup %371 }
 0x1a4   :  { %v148_v34 = vadd.f32 %v147_v31, %v146_v30  ;;  %v156_v35 = vrot.slane %v155_v32, 4  ;;  %v374_v36 = vpop.eup %373  ;;  %v272_v37 = vmul.f32 %v372_v33, %v250_v59 }
 0x1a5   :  { %v273_v39 = vmul.f32 %v374_v36, %v251_v56  ;;  %v281_v40 = vadd.f32 %v374_v36, %v372_v33 }
 0x1a6   :  { %v157_v38 = vadd.f32 %v156_v35, %v155_v32  ;;  %v149_v41 = vrot.slane %v148_v34, 4 }
 0x1a7   :  { %v274_v43 = vadd.f32 %v273_v39, %v272_v37  ;;  %v282_v44 = vrot.slane %v281_v40, 4 }
 0x1a8   :  { %v158_v42 = vrot.slane %v157_v38, 2  ;;  %v150_v47 = vadd.f32 %v149_v41, %v148_v34 }
 0x1a9   :  { %v283_v46 = vadd.f32 %v282_v44, %v281_v40  ;;  %v275_v50 = vrot.slane %v274_v43, 4 }
 0x1aa   :  { %v159_v45 = vadd.f32 %v158_v42, %v157_v38  ;;  %v151_v53 = vrot.slane %v150_v47, 2 }
 0x1ab   :  { %v284_v49 = vrot.slane %v283_v46, 2  ;;  %v276_v54 = vadd.f32 %v275_v50, %v274_v43 }
 0x1ac   :  { %v160_v48 = vrot.slane %v159_v45, 1  ;;  %v152_v58 = vadd.f32 %v151_v53, %v150_v47 }
 0x1ad   :  { %v285_v51 = vadd.f32 %v284_v49, %v283_v46  ;;  %v277_v59 = vrot.slane %v276_v54, 2 }
 0x1ae   :  { %v161_v52 = vadd.f32 %v160_v48, %v159_v45  ;;  %v153_v60 = vrot.slane %v152_v58, 1 }
 0x1af   :  { %v286_v55 = vrot.slane %v285_v51, 1  ;;  %v278_v61 = vadd.f32 %v277_v59, %v276_v54 }
 0x1b0   :  { %375 = vrcp.f32 %v161_v52  ;;  %v154_v62 = vadd.f32 %v153_v60, %v152_v58 }
 0x1b1   :  { %v287_v57 = vadd.f32 %v286_v55, %v285_v51  ;;  %v279_v63 = vrot.slane %v278_v61, 1 }
 0x1b3   :  { %377 = vrcp.f32 %v287_v57  ;;  %v280_v2 = vadd.f32 %v279_v63, %v278_v61 }
 0x1bd   :  { %v376_v0 = vpop.eup %375 }
 0x1be   :  { %v163_v1 = vmul.f32 %v376_v0, %v154_v62 }
 0x1c0   :  { %165 = vst.msk [vmem:[#allocation8] sm:$0x1] %vm164_vm13, %v163_v1  ;;  %v378_v56 = vpop.eup %377 }
 0x1c1   :  { %v289_v3 = vmul.f32 %v378_v56, %v280_v2 }
 0x1c3   :  { %291 = vst.msk [vmem:[#allocation8] sm:$0x1] %vm290_vm14, %v289_v3 }
 0x1c4   :  { %430 = shalt.err (!%p427_p0)
}
 0x1c5   :  { %301 = dma.vmem_to_hbm [thread:$0]  %s299_s6, 16, %s509_s3, [#allocation7]  }
 0x1c6   :  { %443 = dma.done.wait [#allocation7], 16  }
 0x1c7   :  { %444 = vsyncadd [#allocation7], 4294967280 }
 0x1c8   :  { %305 = vsyncpa [#allocation6], 1 }
 0x1c9   :  { %306 = vsyncpa [#allocation7], 1 }

</bundles_post_ra>
